<compile_context>
chip_gen: v6e
topology: v6e:2x2x1
jax: 0.10.0
libtpu: 0.0.40
codegen_flags: <defaults>
</compile_context>

<pallas_src>
import functools

import jax
import jax.numpy as jnp
from jax.experimental import pallas as pl
from jax.experimental.pallas import tpu as pltpu


def _round_up(x: int, m: int) -> int:
    return ((x + m - 1) // m) * m


def _pick_tile_b(batch: int, feat: int, dtype) -> int:
    """Pick a batch-tile size by bytes, accounting for lane padding and dtype packing."""
    itemsize = jnp.dtype(dtype).itemsize
    sublane = max(8, 32 // itemsize)                 # 8 f32, 16 bf16, 32 int8/fp8
    lane_bytes = _round_up(feat, 128) * itemsize     # actual VMEM bytes per row
    target_block_bytes = 2 * 1024 * 1024             # ~2 MiB per block per buffer
    tb = max(sublane, target_block_bytes // lane_bytes)
    tb = min(tb, 8192)
    tb = min(tb, _round_up(batch, sublane))
    tb = max(sublane, (tb // sublane) * sublane)
    return int(tb)
    # TODO(synk): add a feature-axis grid dimension for very large D (blocks
    # currently hold full rows, so huge D inflates the minimum block size).


def _nrmse_tile_kernel(yhat_ref, y_ref, sum_ref, min_ref, max_ref, *,
                       batch, tile_b, feat, need_mask):
    i = pl.program_id(0)

    # In-kernel upcast: inputs stream in their native dtype (half the HBM
    # bytes for bf16), accumulate in f32.
    yhat = yhat_ref[...].astype(jnp.float32)
    y = y_ref[...].astype(jnp.float32)
    inv_feat = 1.0 / feat

    def emit(masked):
        if masked:
            row_ids = i * tile_b + jax.lax.broadcasted_iota(jnp.int32, (tile_b, 1), 0)
            valid = row_ids < batch                       # (tile_b, 1)
            y_min_src = jnp.where(valid, y, jnp.inf)
            y_max_src = jnp.where(valid, y, -jnp.inf)
        else:
            y_min_src = y
            y_max_src = y

        diff = yhat - y
        se = diff * diff
        row_mse = jnp.sum(se, axis=1, keepdims=True) * inv_feat   # (tile_b, 1)
        row_rmse = jnp.sqrt(row_mse + 1e-8)                       # (tile_b, 1)
        if masked:
            row_rmse = jnp.where(valid, row_rmse, 0.0)

        s = jnp.sum(row_rmse, keepdims=True)       # (1, 1) per-tile RMSE sum
        mn = jnp.min(y_min_src, keepdims=True)     # (1, 1) per-tile min(y)
        mx = jnp.max(y_max_src, keepdims=True)     # (1, 1) per-tile max(y)

        # Lane-dense 128-wide partial blocks (one block per grid step).
        sum_ref[...] = jnp.broadcast_to(s, (1, 128))
        min_ref[...] = jnp.broadcast_to(mn, (1, 128))
        max_ref[...] = jnp.broadcast_to(mx, (1, 128))

    if need_mask:
        last = pl.num_programs(0) - 1

        @pl.when(i < last)
        def _interior():
            emit(False)

        @pl.when(i == last)
        def _last():
            emit(True)
    else:
        emit(False)


def nrmse_loss(yhat: jax.Array, y: jax.Array, *, tile_b=None) -> jax.Array:
    """Pallas-TPU implementation of NRMSELoss.forward for 2-D (batch, features) inputs."""
    assert yhat.shape == y.shape and yhat.ndim == 2
    B, D = yhat.shape
    itemsize = jnp.dtype(yhat.dtype).itemsize
    tb = int(tile_b) if tile_b is not None else _pick_tile_b(B, D, yhat.dtype)
    num_tiles = pl.cdiv(B, tb)
    need_mask = (B % tb) != 0

    kernel = functools.partial(_nrmse_tile_kernel, batch=B, tile_b=tb, feat=D,
                               need_mask=need_mask)

    # Real (lane-padded) VMEM bytes: 2 inputs x 2 pipeline buffers + headroom.
    lane_d = _round_up(D, 128)
    block_bytes = tb * lane_d * itemsize
    vmem_limit = int(min(48 << 20, max(16 << 20, 4 * block_bytes + (4 << 20))))

    part_shape = jax.ShapeDtypeStruct((1, num_tiles * 128), jnp.float32)
    part_spec = pl.BlockSpec((1, 128), lambda i: (0, i))

    sum_out, min_out, max_out = pl.pallas_call(
        kernel,
        out_shape=(part_shape, part_shape, part_shape),
        grid=(num_tiles,),
        in_specs=[
            pl.BlockSpec((tb, D), lambda i: (i, 0)),
            pl.BlockSpec((tb, D), lambda i: (i, 0)),
        ],
        out_specs=(part_spec, part_spec, part_spec),
        compiler_params=pltpu.CompilerParams(
            dimension_semantics=("parallel",),       # both TCs on v7x; no-op on v5e/v6e
            vmem_limit_bytes=vmem_limit,
        ),
        cost_estimate=pl.CostEstimate(
            flops=3 * B * D + 2 * B,
            transcendentals=B,
            bytes_accessed=2 * B * D * itemsize + 3 * num_tiles * 128 * 4,
        ),
    )(yhat, y)

    # Tiny host-side (JAX) combine of the per-tile partials.
    part_rmse_sum = sum_out.reshape(num_tiles, 128)[:, 0]
    rmse_mean = jnp.sum(part_rmse_sum) * (1.0 / B)
    denom = jnp.max(max_out) - jnp.min(min_out)      # each lane-block is a broadcast scalar
    return rmse_mean / denom


def _nrmse_ref(yhat, y):
    """Pure-JAX reference (mirrors the PyTorch module exactly)."""
    yhat = yhat.astype(jnp.float32)
    y = y.astype(jnp.float32)
    mse = (yhat - y) ** 2
    mse1 = jnp.mean(mse, axis=1) + 1e-8
    return jnp.mean(jnp.sqrt(mse1)) / (jnp.max(y) - jnp.min(y))


if __name__ == "__main__":
    key = jax.random.PRNGKey(0)
    k1, k2, k3, k4 = jax.random.split(key, 4)

    # Small shapes consistent with the module: batch=8, features=32.
    yhat = jax.random.normal(k1, (8, 32), dtype=jnp.float32)
    y = jax.random.normal(k2, (8, 32), dtype=jnp.float32)
    loss = nrmse_loss(yhat, y)
    jax.block_until_ready(loss)
    ref = _nrmse_ref(yhat, y)
    assert jnp.allclose(loss, ref, rtol=1e-5, atol=1e-6), (loss, ref)

    # Ragged / multi-tile path: B not a multiple of tile_b exercises the
    # last-tile row mask (no wrapper-side padding).
    yhat2 = jax.random.normal(k3, (20, 32), dtype=jnp.float32)
    y2 = jax.random.normal(k4, (20, 32), dtype=jnp.float32)
    loss2 = nrmse_loss(yhat2, y2, tile_b=8)
    jax.block_until_ready(loss2)
    ref2 = _nrmse_ref(yhat2, y2)
    assert jnp.allclose(loss2, ref2, rtol=1e-5, atol=1e-6), (loss2, ref2)

    print("KERNEL_OK")
</pallas_src>

<mosaic_0001>
module attributes {stable_mosaic.version = 11 : i64} {
  func.func @_nrmse_tile_kernel(%arg0: i32, %arg1: memref<8x32xf32, #tpu.memory_space<vmem>>, %arg2: memref<8x32xf32, #tpu.memory_space<vmem>>, %arg3: memref<1x128xf32, #tpu.memory_space<vmem>>, %arg4: memref<1x128xf32, #tpu.memory_space<vmem>>, %arg5: memref<1x128xf32, #tpu.memory_space<vmem>>) attributes {dimension_semantics = [#tpu.dimension_semantics<parallel>], iteration_bounds = array<i64: 1>, scalar_prefetch = 0 : i64, scratch_operands = 0 : i64, tpu.core_type = #tpu.core_type<tc>, window_params = [{transform_indices = @transform_0, window_bounds = array<i64: 8, 32>}, {transform_indices = @transform_1, window_bounds = array<i64: 8, 32>}, {transform_indices = @transform_2, window_bounds = array<i64: 1, 128>}, {transform_indices = @transform_3, window_bounds = array<i64: 1, 128>}, {transform_indices = @transform_4, window_bounds = array<i64: 1, 128>}]} {
    %c0 = arith.constant 0 : index
    %c0_0 = arith.constant 0 : index
    %0 = vector.load %arg1[%c0, %c0_0] : memref<8x32xf32, #tpu.memory_space<vmem>>, vector<8x32xf32>
    %c0_1 = arith.constant 0 : index
    %c0_2 = arith.constant 0 : index
    %1 = vector.load %arg2[%c0_1, %c0_2] : memref<8x32xf32, #tpu.memory_space<vmem>>, vector<8x32xf32>
    %2 = arith.subf %0, %1 : vector<8x32xf32>
    %3 = arith.mulf %2, %2 : vector<8x32xf32>
    %cst = arith.constant dense<0.000000e+00> : vector<8xf32>
    %4 = vector.multi_reduction <add>, %3, %cst [1] : vector<8x32xf32> to vector<8xf32>
    %5 = vector.shape_cast %4 : vector<8xf32> to vector<8x1xf32>
    %cst_3 = arith.constant 3.125000e-02 : f32
    %6 = vector.broadcast %cst_3 : f32 to vector<8x1xf32>
    %7 = arith.mulf %5, %6 : vector<8x1xf32>
    %cst_4 = arith.constant 9.99999993E-9 : f32
    %8 = vector.broadcast %cst_4 : f32 to vector<8x1xf32>
    %9 = arith.addf %7, %8 : vector<8x1xf32>
    %10 = math.sqrt %9 : vector<8x1xf32>
    %11 = vector.shape_cast %10 : vector<8x1xf32> to vector<1x8x1xf32>
    %cst_5 = arith.constant dense<0.000000e+00> : vector<1xf32>
    %12 = vector.multi_reduction <add>, %11, %cst_5 [1, 2] : vector<1x8x1xf32> to vector<1xf32>
    %13 = vector.shape_cast %12 : vector<1xf32> to vector<1x1x1xf32>
    %14 = vector.extract %13[0, 0, 0] : f32 from vector<1x1x1xf32>
    %15 = vector.broadcast %14 : f32 to vector<1x1xf32>
    %16 = vector.shape_cast %1 : vector<8x32xf32> to vector<1x8x32xf32>
    %cst_6 = arith.constant dense<0x7F800000> : vector<1xf32>
    %17 = vector.multi_reduction <minimumf>, %16, %cst_6 [1, 2] : vector<1x8x32xf32> to vector<1xf32>
    %18 = vector.shape_cast %17 : vector<1xf32> to vector<1x1x1xf32>
    %19 = vector.extract %18[0, 0, 0] : f32 from vector<1x1x1xf32>
    %20 = vector.broadcast %19 : f32 to vector<1x1xf32>
    %21 = vector.shape_cast %1 : vector<8x32xf32> to vector<1x8x32xf32>
    %cst_7 = arith.constant dense<0xFF800000> : vector<1xf32>
    %22 = vector.multi_reduction <maximumf>, %21, %cst_7 [1, 2] : vector<1x8x32xf32> to vector<1xf32>
    %23 = vector.shape_cast %22 : vector<1xf32> to vector<1x1x1xf32>
    %24 = vector.extract %23[0, 0, 0] : f32 from vector<1x1x1xf32>
    %25 = vector.broadcast %24 : f32 to vector<1x1xf32>
    %26 = vector.shape_cast %15 : vector<1x1xf32> to vector<1x1xf32>
    %27 = vector.broadcast %26 : vector<1x1xf32> to vector<1x128xf32>
    %c0_8 = arith.constant 0 : index
    %c0_9 = arith.constant 0 : index
    %28 = vector.load %arg3[%c0_8, %c0_9] : memref<1x128xf32, #tpu.memory_space<vmem>>, vector<1x128xf32>
    tpu.vector_store %arg3[%c0_8, %c0_9], %27 {strides = array<i32>} : memref<1x128xf32, #tpu.memory_space<vmem>>, vector<1x128xf32>,
    %29 = vector.shape_cast %20 : vector<1x1xf32> to vector<1x1xf32>
    %30 = vector.broadcast %29 : vector<1x1xf32> to vector<1x128xf32>
    %c0_10 = arith.constant 0 : index
    %c0_11 = arith.constant 0 : index
    %31 = vector.load %arg4[%c0_10, %c0_11] : memref<1x128xf32, #tpu.memory_space<vmem>>, vector<1x128xf32>
    tpu.vector_store %arg4[%c0_10, %c0_11], %30 {strides = array<i32>} : memref<1x128xf32, #tpu.memory_space<vmem>>, vector<1x128xf32>,
    %32 = vector.shape_cast %25 : vector<1x1xf32> to vector<1x1xf32>
    %33 = vector.broadcast %32 : vector<1x1xf32> to vector<1x128xf32>
    %c0_12 = arith.constant 0 : index
    %c0_13 = arith.constant 0 : index
    %34 = vector.load %arg5[%c0_12, %c0_13] : memref<1x128xf32, #tpu.memory_space<vmem>>, vector<1x128xf32>
    tpu.vector_store %arg5[%c0_12, %c0_13], %33 {strides = array<i32>} : memref<1x128xf32, #tpu.memory_space<vmem>>, vector<1x128xf32>,
    return
  }
  func.func @transform_0(%arg0: i32) -> (i32, i32) {
    %c0_i32 = arith.constant 0 : i32
    %c0_i32_0 = arith.constant 0 : i32
    return %arg0, %c0_i32 : i32, i32
  }
  func.func @transform_1(%arg0: i32) -> (i32, i32) {
    %c0_i32 = arith.constant 0 : i32
    %c0_i32_0 = arith.constant 0 : i32
    return %arg0, %c0_i32 : i32, i32
  }
  func.func @transform_2(%arg0: i32) -> (i32, i32) {
    %c0_i32 = arith.constant 0 : i32
    %c0_i32_0 = arith.constant 0 : i32
    return %c0_i32, %arg0 : i32, i32
  }
  func.func @transform_3(%arg0: i32) -> (i32, i32) {
    %c0_i32 = arith.constant 0 : i32
    %c0_i32_0 = arith.constant 0 : i32
    return %c0_i32, %arg0 : i32, i32
  }
  func.func @transform_4(%arg0: i32) -> (i32, i32) {
    %c0_i32 = arith.constant 0 : i32
    %c0_i32_0 = arith.constant 0 : i32
    return %c0_i32, %arg0 : i32, i32
  }
}

</mosaic_0001>

<bundles_post_ra>
// kernel: tpu_custom_call.1
= control target key start
LH: loop header
LB: loop body
LE: loop exit
PB: predicated region body
PF: predicated region fallthrough
CT: control target
= control target key end

     0   :  { %10 = vsyncpa [#allocation3], 0  ;;  %s311_s0 = inlined_call_operand.hbm [shape: f32[8,32], index: 0, kind: input, shape index: {}]   ;;  %s312_s1 = inlined_call_operand.hbm [shape: f32[8,32], index: 1, kind: input, shape index: {}]   ;;  %s313_s2 = inlined_call_operand.hbm [shape: f32[1,128], index: 2, kind: output, shape index: {0}]   ;;  %s314_s3 = inlined_call_operand.hbm [shape: f32[1,128], index: 3, kind: output, shape index: {1}]   ;;  %s315_s4 = inlined_call_operand.hbm [shape: f32[1,128], index: 4, kind: output, shape index: {2}]  }
   0x1   :  { %11 = vsyncpa [#allocation6], 0 }
   0x2   :  { %12 = vsyncpa [#allocation4], 0 }
   0x3   :  { %13 = vsyncpa [#allocation9], 0  ;;  %s258_s15 = smov [#allocation2]   ;;  %s259_s17 = smov [#allocation5]  }
   0x4   :  { %s20_s16 = sshll.u32 %s258_s15, 4  ;;  %s30_s18 = sshll.u32 %s259_s17, 4  ;;  %s21_s16 = int_to_ptr.vmem [resolvable:$true] %s20_s16  ;;  %s31_s18 = int_to_ptr.vmem [resolvable:$true] %s30_s18 }
   0x5   :  { %s158_s19 = scalar_lea.vmem %s21_s16, 128  ;;  %p163_p1 = scmp.lt.s32.totalorder %s21_s16, %s21_s16 }
   0x6   :  { %p159_p0 = scmp.ne.s32.totalorder %s21_s16, %s158_s19  ;;  %p164_p2 = scmp.lt.s32.totalorder %s158_s19, %s158_s19 }
   0x8   :  { %p165_p3 = por %p164_p2, %p163_p1 }
   0xa   :  { %p166_p4 = pnand %p165_p3, %p159_p0 }
   0xc   :  { %169 = shalt.err (!%p166_p4)
}
   0xd   :  { %23 = dma.hbm_to_vmem [thread:$0]  %s311_s0, 128, %s21_s16, [#allocation3]  }
   0xe   :  { %s178_s22 = scalar_lea.vmem %s31_s18, 128  ;;  %p183_p6 = scmp.lt.s32.totalorder %s31_s18, %s31_s18 }
   0xf   :  { %p179_p5 = scmp.ne.s32.totalorder %s31_s18, %s178_s22  ;;  %p184_p7 = scmp.lt.s32.totalorder %s178_s22, %s178_s22 }
  0x11   :  { %p185_p8 = por %p184_p7, %p183_p6 }
  0x13   :  { %p186_p9 = pnand %p185_p8, %p179_p5 }
  0x15   :  { %189 = shalt.err (!%p186_p9)
}
  0x16   :  { %33 = dma.hbm_to_vmem [thread:$0]  %s312_s1, 128, %s31_s18, [#allocation6]  }
  0x17   :  { %250 = dma.done.wait [#allocation3], 128  }
  0x18   :  { %251 = vsyncadd [#allocation3], 4294967168 }
  0x19   :  { %252 = dma.done.wait [#allocation6], 128  }
  0x1a   :  { %253 = vsyncadd [#allocation6], 4294967168  ;;  %v40_v0 = vld [vmem:[#allocation2] sm:$0xff]  ;;  %v41_v1 = vld [vmem:[#allocation5] sm:$0xff]  ;;  %vm44_vm0 = vcmask 261120   ;;  %vm57_vm2 = vcmask 7168  }
  0x1b   :  { %v42_v2 = vsub.f32 %v40_v0, %v41_v1  ;;  %v68_v5 = vsel %vm44_vm0, %v41_v1, inf  ;;  %v78_v6 = vsel %vm44_vm0, %v41_v1, -inf  ;;  %s260_s0 = smov [#allocation7]   ;;  %s261_s25 = smov [#allocation8]  }
  0x1c   :  { %69 = vmin.xlane.f32.xlu1 %v68_v5  ;;  %s100_s1 = sshll.u32 %s260_s0, 4  ;;  %s110_s26 = sshll.u32 %s261_s25, 4  ;;  %s101_s1 = int_to_ptr.vmem [resolvable:$true] %s100_s1  ;;  %s111_s26 = int_to_ptr.vmem [resolvable:$true] %s110_s26 }
  0x1d   :  { %v43_v3 = vmul.f32 %v42_v2, %v42_v2  ;;  %s262_s27 = smov [#allocation10]   ;;  %s190_s6 = scalar_lea.vmem %s101_s1, 16 }
  0x1e   :  { %s120_s28 = sshll.u32 %s262_s27, 4  ;;  %p191_p10 = scmp.ne.s32.totalorder %s101_s1, %s190_s6  ;;  %s294_s28 = int_to_ptr.vmem [resolvable:$true] %s120_s28 }
  0x1f   :  { %v45_v4 = vsel %vm44_vm0, %v43_v3, 0.0  ;;  %s194_s7 = scalar_lea.vmem %s101_s1, 32  ;;  %p195_p11 = scmp.lt.s32.totalorder %s101_s1, %s101_s1 }
  0x20   :  { %46 = vadd.xlane.f32.xlu0 %v45_v4  ;;  %79 = vmax.xlane.f32.xlu1 %v78_v6  ;;  %p196_p12 = scmp.lt.s32.totalorder %s194_s7, %s190_s6 }
  0x22   :  { %p197_p13 = por %p196_p12, %p195_p11 }
  0x24   :  { %p198_p0 = pnand %p197_p13, %p191_p10 }
  0xa5   :  { %v70_v16 = vpop.xlane.xlu1 %69 }
  0xa6   :  { %v71_v18 = vrot.slane %v70_v16, 4 }
  0xa8   :  { %v72_v20 = vmin.f32 %v70_v16, %v71_v18 }
  0xa9   :  { %v47_v7 = vpop.xlane.xlu0 %46  ;;  %v80_v17 = vpop.xlane.xlu1 %79 }
  0xaa   :  { %v48_v8 = vmul.f32 0.03125, %v47_v7  ;;  %v81_v19 = vrot.slane %v80_v17, 4  ;;  %v73_v22 = vrot.slane %v72_v20, 2 }
  0xac   :  { %v49_v9 = vadd.f32 1e-08, %v48_v8  ;;  %v82_v21 = vmax.f32 %v80_v17, %v81_v19  ;;  %v74_v27 = vmin.f32 %v72_v20, %v73_v22 }
  0xae   :  { %148 = vrsqrt.f32 %v49_v9  ;;  %vm52_vm1 = vcmp.eq.f32.partialorder %v49_v9, inf  ;;  %v55_v12 = vand.u32 2147483648, %v49_v9  ;;  %vm54_vm3 = vcmp.eq.f32.partialorder %v49_v9, 0.0 }
  0xaf   :  { %v83_v24 = vrot.slane %v82_v21, 2  ;;  %v75_v31 = vrot.slane %v74_v27, 1 }
  0xb1   :  { %v84_v28 = vmax.f32 %v82_v21, %v83_v24  ;;  %v76_v35 = vmin.f32 %v74_v27, %v75_v31 }
  0xb3   :  { %v85_v33 = vrot.slane %v84_v28, 1 }
  0xb5   :  { %v86_v36 = vmax.f32 %v84_v28, %v85_v33 }
  0xbb   :  { %v149_v10 = vpop.eup %148 }
  0xbc   :  { %v51_v11 = vmul.f32 %v149_v10, %v49_v9 }
  0xbe   :  { %v53_v13 = vsel %vm52_vm1, %v49_v9, %v51_v11 }
  0xbf   :  { %v56_v14 = vsel %vm54_vm3, %v55_v12, %v53_v13 }
  0xc0   :  { %v58_v15 = vsel %vm57_vm2, %v56_v14, 0.0 }
  0xc1   :  { %59 = vadd.xlane.f32.xlu0 %v58_v15 }
 0x14a   :  { %v60_v23 = vpop.xlane.xlu0 %59 }
 0x14b   :  { %v61_v25 = vrot.slane %v60_v23, 4 }
 0x14d   :  { %v62_v26 = vadd.f32 %v61_v25, %v60_v23 }
 0x14f   :  { %v63_v29 = vrot.slane %v62_v26, 2 }
 0x151   :  { %v64_v30 = vadd.f32 %v63_v29, %v62_v26 }
 0x153   :  { %v65_v32 = vrot.slane %v64_v30, 1 }
 0x155   :  { %v66_v34 = vadd.f32 %v65_v32, %v64_v30 }
 0x157   :  { %137 = vpush %v66_v34 }
 0x158   :  { %139 = vpush %v76_v35 }
 0x159   :  { %141 = vpush %v86_v36 }
 0x188   :  { %s138_s29 = spop %137 }
 0x189   :  { %v88_v37 = vstv %s138_s29  ;;  %s140_s30 = spop %139 }
 0x18a   :  { %89 = vst [vmem:[#allocation7] sm:$0x1] %v88_v37  ;;  %v90_v38 = vstv %s140_s30  ;;  %s142_s5 = spop %141 }
 0x18b   :  { %91 = vst [vmem:[#allocation8] sm:$0x1] %v90_v38  ;;  %v92_v39 = vstv %s142_s5 }
 0x18c   :  { %201 = shalt.err (!%p198_p0)
}
 0x18d   :  { %103 = dma.vmem_to_hbm [thread:$0]  %s101_s1, 16, %s313_s2, [#allocation4]   ;;  %93 = vst [vmem:[#allocation10] sm:$0x1] %v92_v39 }
 0x18e   :  { %s210_s10 = scalar_lea.vmem %s111_s26, 16  ;;  %s214_s11 = scalar_lea.vmem %s111_s26, 32 }
 0x18f   :  { %p211_p1 = scmp.ne.s32.totalorder %s111_s26, %s210_s10  ;;  %p215_p2 = scmp.lt.s32.totalorder %s111_s26, %s111_s26 }
 0x190   :  { %p216_p3 = scmp.lt.s32.totalorder %s214_s11, %s210_s10 }
 0x192   :  { %p217_p4 = por %p216_p3, %p215_p2 }
 0x194   :  { %p218_p5 = pnand %p217_p4, %p211_p1 }
 0x196   :  { %221 = shalt.err (!%p218_p5)
}
 0x197   :  { %113 = dma.vmem_to_hbm [thread:$0]  %s111_s26, 16, %s314_s3, [#allocation9]  }
 0x198   :  { %s230_s14 = scalar_lea.vmem %s294_s28, 16  ;;  %s234_s2 = scalar_lea.vmem %s294_s28, 32 }
 0x199   :  { %p231_p6 = scmp.ne.s32.totalorder %s294_s28, %s230_s14  ;;  %p235_p7 = scmp.lt.s32.totalorder %s294_s28, %s294_s28 }
 0x19a   :  { %p236_p8 = scmp.lt.s32.totalorder %s234_s2, %s230_s14 }
 0x19c   :  { %p237_p9 = por %p236_p8, %p235_p7 }
 0x19e   :  { %p238_p10 = pnand %p237_p9, %p231_p6 }
 0x1a0   :  { %241 = shalt.err (!%p238_p10)
}
 0x1a1   :  { %123 = dma.vmem_to_hbm [thread:$0]  %s294_s28, 16, %s315_s4, [#allocation9]  }
 0x1a2   :  { %254 = dma.done.wait [#allocation4], 16  }
 0x1a3   :  { %255 = vsyncadd [#allocation4], 4294967280 }
 0x1a4   :  { %256 = dma.done.wait [#allocation9], 32  }
 0x1a5   :  { %257 = vsyncadd [#allocation9], 4294967264 }
 0x1a6   :  { %133 = vsyncpa [#allocation3], 1 }
 0x1a7   :  { %134 = vsyncpa [#allocation6], 1 }
 0x1a8   :  { %135 = vsyncpa [#allocation4], 1 }
 0x1a9   :  { %136 = vsyncpa [#allocation9], 1 }

</bundles_post_ra>
